<compile_context>
chip_gen: v7x
topology: tpu7x:2x2x1
jax: 0.10.0
libtpu: 0.0.40
codegen_flags: <defaults>
</compile_context>

<pallas_src>
import jax
import jax.numpy as jnp
from jax.experimental import pallas as pl
from jax.experimental.pallas import tpu as pltpu

import math


def _affine_grid_kernel(p_ref, q_ref, out_ref):
    # p_ref, q_ref: VMEM (Bblk, 1, RW2)  -- per-batch lane rows
    # out_ref:      VMEM (Bblk, tile_r, RW2)
    tile_r = out_ref.shape[1]
    r0 = pl.program_id(1) * tile_r          # first packed row of this block
    rr = (r0 + jax.lax.broadcasted_iota(jnp.int32, (1, tile_r, 1), 1)
          ).astype(jnp.float32)
    # out[b, r, l] = P[b, l] + r * Q[b, l]   (one FMA per output element)
    out_ref[...] = p_ref[...] + rr * q_ref[...]


def _pack_factor(H, W):
    """Image rows packed per lane row so the lane width R*2W is a multiple
    of 128 (unmasked full-width stores).  Falls back to 1 when impossible."""
    w2 = 2 * W
    r0 = 128 // math.gcd(w2, 128)
    return r0 if (H % r0 == 0) else 1


def _choose_blocking(B, HR, RW2, budget_bytes=6 << 20):
    """Pick (Bblk, tile_r) for the (Bblk, tile_r, RW2) f32 output block.

    Bytes-driven: target ~6 MiB per block (double-buffered -> ~12 MiB, within
    the 32 MiB vmem limit we request).  tile_r is the full packed-row count
    unless a single batch element exceeds the budget; a batch block prefers a
    divisor of B so no padding (and no post-kernel slice copy) is needed."""
    row_bytes = RW2 * 4
    plane_bytes = HR * row_bytes

    # Packed rows per block: whole plane unless one batch element alone
    # exceeds the budget (then use an 8-multiple divisor of HR that fits).
    tile_r = HR
    if plane_bytes > budget_bytes:
        for d in range(8 * (HR // 8), 7, -8):
            if HR % d == 0 and d * row_bytes <= budget_bytes:
                tile_r = d
                break

    # Batch elements per block: bytes-driven, prefer a divisor of B.
    block_batch_bytes = tile_r * row_bytes
    target = max(1, budget_bytes // max(block_batch_bytes, 1))
    if target >= B:
        bblk = B
    else:
        bblk = target
        for d in range(target, max(target // 2, 1) - 1, -1):
            if B % d == 0:
                bblk = d
                break

    # Force >= 2 grid steps for non-tiny single-block problems so both v7x
    # TensorCores get work -- but never by introducing batch padding (the
    # post-kernel slice copy would cost more than the dual-core win).
    n_b = -(-B // bblk)
    n_r = HR // tile_r
    if n_b * n_r == 1 and B * plane_bytes > (4 << 20):
        if B >= 2 and B % 2 == 0:
            bblk = B // 2
        elif B >= 2:
            d = max(x for x in range(1, B) if B % x == 0)
            if d * block_batch_bytes >= (1 << 20):
                bblk = d
        else:
            for d in range(8 * (HR // 8), 7, -8):
                if HR % d == 0 and d < HR:
                    tile_r = d
                    break
    return bblk, tile_r


def affine_grid_gen(theta, out_h=240, out_w=240, out_ch=3):
    """Pallas equivalent of AffineGridGen.forward (align_corners=False)."""
    del out_ch  # does not affect the grid values
    theta = theta.astype(jnp.float32)
    B = int(theta.shape[0])
    H, W = int(out_h), int(out_w)
    W2 = 2 * W
    R = _pack_factor(H, W)       # image rows packed per lane row
    HR = H // R                  # packed rows per image
    RW2 = R * W2                 # lane width of one packed row

    Bblk, tile_r = _choose_blocking(B, HR, RW2)
    n_b = pl.cdiv(B, Bblk)
    n_r = HR // tile_r
    B_pad = n_b * Bblk

    # ---- tiny per-batch lane rows P, Q (the only streamed inputs) ----------
    # lane l of a packed row encodes: k = image row within the pack,
    # w = image column, c = output channel (0 -> x, 1 -> y).
    l = jnp.arange(RW2, dtype=jnp.int32)
    k = l // W2
    m = l % W2
    w = m // 2
    c = m % 2
    x_l = 2.0 * (w.astype(jnp.float32) + 0.5) / W - 1.0   # normalized x
    ck = 2.0 * (k.astype(jnp.float32) + 0.5) / H - 1.0    # y at packed offset k
    a = 2.0 * R / H                                        # y step per packed row

    is_x = (c == 0)[None, :]
    t = theta.reshape(B, 6)  # [t00, t01, t02, t10, t11, t12]
    sx = jnp.where(is_x, t[:, 0:1], t[:, 3:4])   # x slope   (B, RW2)
    sy = jnp.where(is_x, t[:, 1:2], t[:, 4:5])   # y slope
    of = jnp.where(is_x, t[:, 2:3], t[:, 5:6])   # offset
    P = (sx * x_l[None, :] + of + ck[None, :] * sy).reshape(B, 1, RW2)
    Q = (a * sy).reshape(B, 1, RW2)

    if B_pad != B:
        pad = ((0, B_pad - B), (0, 0), (0, 0))
        P = jnp.pad(P, pad)
        Q = jnp.pad(Q, pad)

    grid_flat = pl.pallas_call(
        _affine_grid_kernel,
        out_shape=jax.ShapeDtypeStruct((B_pad, HR, RW2), jnp.float32),
        grid_spec=pltpu.PrefetchScalarGridSpec(
            num_scalar_prefetch=0,
            grid=(n_b, n_r),
            in_specs=[
                pl.BlockSpec((Bblk, 1, RW2), lambda bi, ri: (bi, 0, 0)),
                pl.BlockSpec((Bblk, 1, RW2), lambda bi, ri: (bi, 0, 0)),
            ],
            out_specs=pl.BlockSpec((Bblk, tile_r, RW2),
                                   lambda bi, ri: (bi, ri, 0)),
        ),
        compiler_params=pltpu.CompilerParams(
            dimension_semantics=("parallel", "parallel"),
            vmem_limit_bytes=32 * 1024 * 1024,
        ),
    )(P, Q)

    if B_pad != B:
        grid_flat = grid_flat[:B]
    # (B, HR, R*2W) row-major is identical to (B, H, W, 2) row-major:
    # the reshape is free (no transpose, no re-streaming).
    return grid_flat.reshape(B, H, W, 2)


def _reference_affine_grid(theta, out_h, out_w):
    """Pure-JAX reference of F.affine_grid (align_corners=False)."""
    xs = 2.0 * (jnp.arange(out_w, dtype=jnp.float32) + 0.5) / out_w - 1.0
    ys = 2.0 * (jnp.arange(out_h, dtype=jnp.float32) + 0.5) / out_h - 1.0
    xg, yg = jnp.meshgrid(xs, ys, indexing="xy")  # (H, W)
    base = jnp.stack([xg, yg, jnp.ones_like(xg)], axis=-1)  # (H, W, 3)
    return jnp.einsum("hwk,bjk->bhwj", base, theta.astype(jnp.float32))


if __name__ == "__main__":
    key = jax.random.PRNGKey(0)

    def check(theta, H, W, name):
        grid = affine_grid_gen(theta, out_h=H, out_w=W, out_ch=3)
        grid = jax.block_until_ready(grid)
        assert grid.shape == (theta.shape[0], H, W, 2), (name, grid.shape)
        ref = _reference_affine_grid(theta, H, W)
        assert jnp.allclose(grid, ref, atol=1e-5, rtol=1e-5), f"mismatch: {name}"

    # Case 1: small shapes consistent with the module (batch=2, 16x16 grid).
    # Exercises the lane-dense packed path (R=4, 128-lane rows).
    B = 2
    identity = jnp.tile(
        jnp.array([[1.0, 0.0, 0.0], [0.0, 1.0, 0.0]], dtype=jnp.float32),
        (B, 1, 1),
    )
    theta1 = identity + 0.1 * jax.random.normal(key, (B, 2, 3), dtype=jnp.float32)
    check(theta1, 16, 16, "case1")

    # Case 2: batch=10 (multi-element batch block), 16x16.
    theta2 = 0.5 * jax.random.normal(jax.random.PRNGKey(1), (10, 2, 3), jnp.float32)
    check(theta2, 16, 16, "case2")

    # Case 3: module defaults 240x240, batch=3 (R=4, 1920-lane packed rows).
    theta3 = 0.3 * jax.random.normal(jax.random.PRNGKey(2), (3, 2, 3), jnp.float32)
    check(theta3, 240, 240, "case3")

    # Case 4: shape where lane packing is impossible (R=1 fallback), 24x20.
    theta4 = 0.3 * jax.random.normal(jax.random.PRNGKey(3), (2, 2, 3), jnp.float32)
    check(theta4, 24, 20, "case4")

    print("KERNEL_OK")
</pallas_src>

<mosaic_0001>
module attributes {stable_mosaic.version = 11 : i64} {
  func.func @_affine_grid_kernel(%arg0: i32, %arg1: i32, %arg2: memref<2x1x128xf32, #tpu.memory_space<vmem>>, %arg3: memref<2x1x128xf32, #tpu.memory_space<vmem>>, %arg4: memref<2x4x128xf32, #tpu.memory_space<vmem>>) attributes {dimension_semantics = [#tpu.dimension_semantics<parallel>, #tpu.dimension_semantics<parallel>], iteration_bounds = array<i64: 1, 1>, scalar_prefetch = 0 : i64, scratch_operands = 0 : i64, tpu.core_type = #tpu.core_type<tc>, window_params = [{transform_indices = @transform_0, window_bounds = array<i64: 2, 1, 128>}, {transform_indices = @transform_1, window_bounds = array<i64: 2, 1, 128>}, {transform_indices = @transform_2, window_bounds = array<i64: 2, 4, 128>}]} {
    %c4_i32 = arith.constant 4 : i32
    %0 = arith.muli %arg1, %c4_i32 : i32
    %1 = tpu.iota {dimensions = array<i32: 1>} : vector<1x4x1xi32>
    %2 = vector.broadcast %0 : i32 to vector<1x4x1xi32>
    %3 = arith.addi %2, %1 : vector<1x4x1xi32>
    %4 = arith.sitofp %3 : vector<1x4x1xi32> to vector<1x4x1xf32>
    %c0 = arith.constant 0 : index
    %c0_0 = arith.constant 0 : index
    %c0_1 = arith.constant 0 : index
    %5 = vector.load %arg2[%c0, %c0_0, %c0_1] : memref<2x1x128xf32, #tpu.memory_space<vmem>>, vector<2x1x128xf32>
    %c0_2 = arith.constant 0 : index
    %c0_3 = arith.constant 0 : index
    %c0_4 = arith.constant 0 : index
    %6 = vector.load %arg3[%c0_2, %c0_3, %c0_4] : memref<2x1x128xf32, #tpu.memory_space<vmem>>, vector<2x1x128xf32>
    %7 = vector.broadcast %4 : vector<1x4x1xf32> to vector<2x4x128xf32>
    %8 = vector.broadcast %6 : vector<2x1x128xf32> to vector<2x4x128xf32>
    %9 = arith.mulf %7, %8 : vector<2x4x128xf32>
    %10 = vector.broadcast %5 : vector<2x1x128xf32> to vector<2x4x128xf32>
    %11 = arith.addf %10, %9 : vector<2x4x128xf32>
    %c0_5 = arith.constant 0 : index
    %c0_6 = arith.constant 0 : index
    %c0_7 = arith.constant 0 : index
    %12 = vector.load %arg4[%c0_5, %c0_6, %c0_7] : memref<2x4x128xf32, #tpu.memory_space<vmem>>, vector<2x4x128xf32>
    tpu.vector_store %arg4[%c0_5, %c0_6, %c0_7], %11 {strides = array<i32>} : memref<2x4x128xf32, #tpu.memory_space<vmem>>, vector<2x4x128xf32>,
    return
  }
  func.func @transform_0(%arg0: i32, %arg1: i32) -> (i32, i32, i32) {
    %c0_i32 = arith.constant 0 : i32
    %c0_i32_0 = arith.constant 0 : i32
    %c0_i32_1 = arith.constant 0 : i32
    return %arg0, %c0_i32, %c0_i32_0 : i32, i32, i32
  }
  func.func @transform_1(%arg0: i32, %arg1: i32) -> (i32, i32, i32) {
    %c0_i32 = arith.constant 0 : i32
    %c0_i32_0 = arith.constant 0 : i32
    %c0_i32_1 = arith.constant 0 : i32
    return %arg0, %c0_i32, %c0_i32_0 : i32, i32, i32
  }
  func.func @transform_2(%arg0: i32, %arg1: i32) -> (i32, i32, i32) {
    %c0_i32 = arith.constant 0 : i32
    %c0_i32_0 = arith.constant 0 : i32
    return %arg0, %arg1, %c0_i32 : i32, i32, i32
  }
}

</mosaic_0001>

<bundles_post_ra>
// kernel: tpu_custom_call.1
= control target key start
LH: loop header
LB: loop body
LE: loop exit
PB: predicated region body
PF: predicated region fallthrough
CT: control target
= control target key end

     0   :  { %7 = vsyncpa [#allocation3], 0  ;;  %s192_s0 = inlined_call_operand.hbm [shape: f32[2,1,128], index: 0, kind: input, shape index: {}]   ;;  %s193_s1 = inlined_call_operand.vmem [shape: f32[2,1,128], index: 1, kind: input, shape index: {}]   ;;  %s194_s2 = inlined_call_operand.hbm [shape: f32[2,4,128], index: 2, kind: output, shape index: {}]  }
   0x1   :  { %8 = vsyncpa [#allocation4], 0  ;;  %s141_s9 = smov [#allocation2]   ;;  %s93_s13 = scalar_lea.hbm %s192_s0, 32 }
   0x2   :  { %s14_s10 = sshll.u32 %s141_s9, 4  ;;  %p94_p0 = scmp.ne.s32.totalorder %s192_s0, %s93_s13  ;;  %s15_s10 = int_to_ptr.vmem [resolvable:$true] %s14_s10 }
   0x3   :  { %p97_p1 = scmp.lt.u32.totalorder %s93_s13, %s192_s0 }
   0x5   :  { %p99_p2 = pnand %p97_p1, %p94_p0 }
   0x7   :  { %102 = shalt.err (!%p99_p2)
}
   0x8   :  { %s103_s18 = scalar_lea.vmem %s15_s10, 32  ;;  %p108_p4 = scmp.lt.s32.totalorder %s15_s10, %s15_s10 }
   0x9   :  { %p104_p3 = scmp.ne.s32.totalorder %s15_s10, %s103_s18  ;;  %p109_p5 = scmp.lt.s32.totalorder %s103_s18, %s103_s18 }
   0xb   :  { %p110_p6 = por %p109_p5, %p108_p4 }
   0xd   :  { %p111_p7 = pnand %p110_p6, %p104_p3 }
   0xf   :  { %114 = shalt.err (!%p111_p7)
}
  0x10   :  { %s142_s19 = smov 16   ;;  %s143_s20 = smov 1  }
  0x11   :  { %20 = dma.hbm_to_vmem [thread:$0]  %s192_s0, 32, %s15_s10, [#allocation3], %s142_s19, %s142_s19, %s143_s20  }
  0x12   :  { %137 = dma.done.wait [#allocation3], 32  }
  0x13   :  { %138 = vsyncadd [#allocation3], 4294967264  ;;  %v27_v0 = vlaneseq  ;;  %v85_v3 = vld [vmem:[#allocation2] ss:$0 sm:$0xff]  ;;  %v86_v6 = vld [vmem:[#allocation2 + $0x1] ss:$0 sm:$0xff] }
  0x14   :  { %v83_v4 = vld [vmem:[%s193_s1] ss:$0 sm:$0xff]  ;;  %v84_v7 = vld [vmem:[%s193_s1 + $0x1] ss:$0 sm:$0xff]  ;;  %s144_s27 = smov [#allocation5]  }
  0x15   :  { %v28_v1 = vshrl.u32 %v27_v0, 7  ;;  %s71_s28 = sshll.u32 %s144_s27, 4  ;;  %s72_s28 = int_to_ptr.vmem [resolvable:$true] %s71_s28 }
  0x16   :  { %s115_s0 = scalar_lea.vmem %s72_s28, 128  ;;  %p120_p9 = scmp.lt.s32.totalorder %s72_s28, %s72_s28 }
  0x17   :  { %v31_v2 = vcvt.s32.f32 %v28_v1  ;;  %p116_p8 = scmp.ne.s32.totalorder %s72_s28, %s115_s0  ;;  %p121_p10 = scmp.lt.s32.totalorder %s115_s0, %s115_s0 }
  0x19   :  { %v48_v5 = vmul.f32 %v83_v4, %v31_v2  ;;  %v49_v8 = vmul.f32 %v84_v7, %v31_v2  ;;  %p122_p11 = por %p121_p10, %p120_p9 }
  0x1b   :  { %v62_v9 = vadd.f32 %v85_v3, %v48_v5  ;;  %v63_v10 = vadd.f32 %v86_v6, %v49_v8  ;;  %p123_p12 = pnand %p122_p11, %p116_p8 }
  0x1d   :  { %64 = vst [vmem:[#allocation5] sm:$0xf] %v62_v9  ;;  %65 = vst [vmem:[#allocation5 + $0x4] sm:$0xf] %v63_v10 }
  0x1e   :  { %126 = shalt.err (!%p123_p12)
}
  0x1f   :  { %s127_s3 = scalar_lea.hbm %s194_s2, 128 }
  0x20   :  { %p128_p13 = scmp.ne.s32.totalorder %s194_s2, %s127_s3  ;;  %p131_p0 = scmp.lt.u32.totalorder %s127_s3, %s194_s2 }
  0x22   :  { %p133_p1 = pnand %p131_p0, %p128_p13 }
  0x24   :  { %136 = shalt.err (!%p133_p1)
}
  0x25   :  { %s145_s7 = smov 64   ;;  %s146_s8 = smov 4  }
  0x26   :  { %77 = dma.vmem_to_hbm [thread:$0]  %s72_s28, 128, %s194_s2, [#allocation4], %s145_s7, %s145_s7, %s146_s8  }
  0x27   :  { %139 = dma.done.wait [#allocation4], 128  }
  0x28   :  { %140 = vsyncadd [#allocation4], 4294967168 }
  0x29   :  { %81 = vsyncpa [#allocation3], 1 }
  0x2a   :  { %82 = vsyncpa [#allocation4], 1 }

</bundles_post_ra>
